<compile_context>
chip_gen: v7x
topology: tpu7x:2x2x1
jax: 0.10.0
libtpu: 0.0.40
codegen_flags: <defaults>
</compile_context>

<pallas_src>
import functools

import jax
import jax.numpy as jnp
from jax.experimental import pallas as pl
from jax.experimental.pallas import tpu as pltpu


def _taught_self_attn_kernel(iq_ref, scores_ref, wv_t_ref, bv_ref, wo_t_ref, bo_ref,
                             out_ref, *scratch,
                             num_head, attn_dim, cache_v, use_ctx_scratch):
    # iq_ref:     (1, N, isize)        full key/value-side activations
    # scores_ref: (1, H, TQ, Nk)       query tile of post-softmax attention weights
    # wv_t_ref:   (isize, hsize)       pre-transposed adaptor weight
    # bv_ref:     (1, hsize)           f32
    # wo_t_ref:   (hsize, osize)       pre-transposed outer weight
    # bo_ref:     (1, osize)           f32
    # out_ref:    (1, TQ, osize)
    idx = 0
    v_cache = None
    if cache_v:
        v_cache = scratch[idx]
        idx += 1
    ctx_scr = None
    if use_ctx_scratch:
        ctx_scr = scratch[idx]
        idx += 1

    compute_dtype = scores_ref.dtype

    def _compute_v():
        # adaptor: V = iQ @ Wv^T + bv -> (Nk, hsize); f32 accumulation, f32 bias.
        return (jnp.dot(iq_ref[0], wv_t_ref[...],
                        preferred_element_type=jnp.float32) + bv_ref[...])

    if cache_v:
        # V only depends on the batch index: compute on the first query tile of
        # each batch, reuse for the remaining q tiles (q axis is "arbitrary", so
        # the scratch persists across q steps of the same batch).
        @pl.when(pl.program_id(1) == 0)
        def _():
            v_cache[...] = _compute_v().astype(v_cache.dtype)

        v = v_cache[...]
    else:
        v = _compute_v().astype(compute_dtype)

    wo_t = wo_t_ref[...]

    if use_ctx_scratch:
        # adim is a multiple of 128: write each per-head ctx straight into a
        # lane-aligned column window of a (TQ, hsize) f32 scratch slab, then run
        # one lane-dense output projection (no concatenate, bounded live ranges).
        for h in range(num_head):                                    # static unroll
            s_h = scores_ref[0, h]                                   # (TQ, Nk)
            v_h = v[:, h * attn_dim:(h + 1) * attn_dim]              # (Nk, adim)
            ctx_scr[:, h * attn_dim:(h + 1) * attn_dim] = jnp.dot(
                s_h, v_h, preferred_element_type=jnp.float32)
        out = jnp.dot(ctx_scr[...].astype(wo_t.dtype), wo_t,
                      preferred_element_type=jnp.float32)             # (TQ, osize)
    else:
        # Re-associated fused path: ctx_h = scores_h @ V_h first (dominant matmul
        # keeps its N-dim == adim), then accumulate ctx_h @ Wo_t[h-slice] into an
        # osize-wide, lane-dense f32 accumulator.  Same FLOPs as the reference
        # order; no concatenate, no (Nk, osize) intermediates.
        out = None
        for h in range(num_head):                                    # static unroll
            s_h = scores_ref[0, h]                                   # (TQ, Nk)
            v_h = v[:, h * attn_dim:(h + 1) * attn_dim]              # (Nk, adim)
            ctx_h = jnp.dot(s_h, v_h, preferred_element_type=jnp.float32)
            part = jnp.dot(ctx_h.astype(wo_t.dtype),
                           wo_t[h * attn_dim:(h + 1) * attn_dim, :],
                           preferred_element_type=jnp.float32)        # (TQ, osize)
            out = part if out is None else out + part

    out = out + bo_ref[...]                                           # bias once, f32
    out_ref[0] = out.astype(out_ref.dtype)


def _default_vmem_limit_bytes():
    """Device-aware VMEM limit: big tiles on 128 MiB chips, headroom on v7x."""
    cap = None
    try:
        cap = getattr(pltpu.get_tpu_info(), "vmem_capacity_bytes", None)
    except Exception:
        cap = None
    if cap is None:
        cap = 64 * 1024 * 1024                 # unknown: assume smallest (v7x-safe)
    if cap >= 128 * 1024 * 1024:               # v5e / v6e
        return 100 * 1024 * 1024
    return 40 * 1024 * 1024                    # v7x: headroom under 64 MiB physical


def _pick_query_tile(n, *, num_head, isize, hsize, osize, itemsize,
                     budget_bytes, cache_v, max_tile=1024):
    """Largest query tile (multiple of 8 dividing n, or n itself) whose working
    set fits the VMEM budget."""
    # Single-buffered constant-index operands (pl.Buffered(1)) + f32 biases.
    fixed = (n * isize + isize * hsize + hsize * osize) * itemsize
    fixed += (hsize + osize) * 4
    if cache_v:
        fixed += n * hsize * itemsize          # persistent V-cache scratch

    def working_set(tq):
        b = 2 * num_head * tq * n * itemsize   # double-buffered scores tile
        b += 2 * tq * osize * itemsize         # double-buffered output tile
        b += tq * hsize * 4                    # f32 ctx scratch / per-head temps
        b += tq * osize * 4                    # f32 output accumulator
        return fixed + b

    cands = {d for d in range(8, min(n, max_tile) + 1, 8) if n % d == 0}
    if n <= max_tile:
        cands.add(n)
    if not cands:
        cands = {n}
    cands = sorted(cands, reverse=True)
    for tq in cands:
        if working_set(tq) <= budget_bytes:
            return tq
    # Nothing fits: return the smallest legal tile (see TODO(synk) on the Nk axis).
    return cands[-1]


def taught_self_attn(iq, scores, wv, bv, wo, bo, *, num_head,
                     compute_dtype=None, query_tile=None, cache_v=None,
                     vmem_limit_bytes=None):
    """iq: (B, N, isize); scores: (B, H, N, N); wv: (hsize, isize); wo: (osize, hsize)."""
    B, N, isize = iq.shape
    hsize = wv.shape[0]
    osize = wo.shape[0]
    attn_dim = hsize // num_head
    out_dtype = iq.dtype

    # Optional reduced-precision compute (recommended: jnp.bfloat16 on v6e/v7x).
    # Halves the dominant scores HBM stream and VMEM footprint; accumulation
    # stays f32 inside the kernel via preferred_element_type.
    if compute_dtype is not None:
        iq = iq.astype(compute_dtype)
        scores = scores.astype(compute_dtype)
        wv = wv.astype(compute_dtype)
        wo = wo.astype(compute_dtype)
    compute_dt = iq.dtype
    itemsize = jnp.dtype(compute_dt).itemsize

    # Glue: pre-transpose weights (Linear uses y = x @ W^T + b); biases in f32.
    wv_t = wv.T                                   # (isize, hsize)
    wo_t = wo.T                                   # (hsize, osize)
    bv2 = bv.astype(jnp.float32).reshape(1, hsize)
    bo2 = bo.astype(jnp.float32).reshape(1, osize)

    if vmem_limit_bytes is None:
        vmem_limit_bytes = _default_vmem_limit_bytes()
    budget = int(0.85 * vmem_limit_bytes)

    if query_tile is not None:
        tq = query_tile
    else:
        tq = _pick_query_tile(N, num_head=num_head, isize=isize, hsize=hsize,
                              osize=osize, itemsize=itemsize,
                              budget_bytes=budget, cache_v=(B > 1))
    assert N % tq == 0, "query_tile must divide N"
    assert tq == N or tq % 8 == 0, "query_tile must be a multiple of 8 (or == N)"
    n_qt = N // tq

    if cache_v is None:
        # Cache V across query tiles (q axis becomes "arbitrary").  Skip when
        # B == 1 so q can stay "parallel" for v7x's two TensorCores.
        cache_v = (n_qt > 1) and (B > 1)
    use_ctx_scratch = (attn_dim % 128 == 0)

    scratch_shapes = []
    if cache_v:
        scratch_shapes.append(pltpu.VMEM((N, hsize), compute_dt))
    if use_ctx_scratch:
        scratch_shapes.append(pltpu.VMEM((tq, hsize), jnp.float32))

    kernel = functools.partial(_taught_self_attn_kernel,
                               num_head=num_head, attn_dim=attn_dim,
                               cache_v=cache_v, use_ctx_scratch=use_ctx_scratch)

    # Constant-index operands: single buffer (no pointless double buffering).
    const_buf = pl.Buffered(1)

    return pl.pallas_call(
        kernel,
        out_shape=jax.ShapeDtypeStruct((B, N, osize), out_dtype),
        grid_spec=pltpu.PrefetchScalarGridSpec(
            num_scalar_prefetch=0,
            grid=(B, n_qt),
            in_specs=[
                # Full iq block (all keys needed for V); block index only changes
                # with b, so single-buffering just exposes one DMA per batch.
                pl.BlockSpec((1, N, isize), lambda b, q: (b, 0, 0),
                             pipeline_mode=const_buf),
                # Query-tiled scores: the dominant, double-buffered HBM stream.
                pl.BlockSpec((1, num_head, tq, N), lambda b, q: (b, 0, q, 0)),
                pl.BlockSpec((isize, hsize), lambda b, q: (0, 0),
                             pipeline_mode=const_buf),
                pl.BlockSpec((1, hsize), lambda b, q: (0, 0),
                             pipeline_mode=const_buf),
                pl.BlockSpec((hsize, osize), lambda b, q: (0, 0),
                             pipeline_mode=const_buf),
                pl.BlockSpec((1, osize), lambda b, q: (0, 0),
                             pipeline_mode=const_buf),
            ],
            out_specs=pl.BlockSpec((1, tq, osize), lambda b, q: (b, q, 0)),
            scratch_shapes=tuple(scratch_shapes),
        ),
        compiler_params=pltpu.CompilerParams(
            dimension_semantics=("parallel",
                                 "arbitrary" if cache_v else "parallel"),
            vmem_limit_bytes=vmem_limit_bytes),
    )(iq, scores, wv_t, bv2, wo_t, bo2)


def taught_self_attn_ref(iq, scores, wv, bv, wo, bo, *, num_head):
    """Plain-JAX reference mirroring the PyTorch forward exactly."""
    B, N, _ = iq.shape
    hsize = wv.shape[0]
    adim = hsize // num_head
    real_iV = (iq @ wv.T + bv).reshape(B, N, num_head, adim).transpose(0, 2, 1, 3)
    ctx = jnp.einsum("bhqk,bhkd->bhqd", scores, real_iV)
    ctx = ctx.transpose(0, 2, 1, 3).reshape(B, N, hsize)
    return ctx @ wo.T + bo


if __name__ == "__main__":
    # Small shapes consistent with the module.
    B, N = 2, 8
    isize, hsize, osize = 32, 32, 32
    num_head = 8

    key = jax.random.PRNGKey(0)
    k_iq, k_sc, k_wv, k_bv, k_wo, k_bo = jax.random.split(key, 6)

    iq = jax.random.normal(k_iq, (B, N, isize), dtype=jnp.float32)
    # scores as produced by the teacher SelfAttn (post-softmax attention weights).
    scores = jax.nn.softmax(
        jax.random.normal(k_sc, (B, num_head, N, N), dtype=jnp.float32), axis=-1)

    # Deterministic synthetic parameters — Linear(isize, hsize) / Linear(hsize, osize).
    wv = jax.random.normal(k_wv, (hsize, isize), dtype=jnp.float32) * 0.1
    bv = jax.random.normal(k_bv, (hsize,), dtype=jnp.float32) * 0.1
    wo = jax.random.normal(k_wo, (osize, hsize), dtype=jnp.float32) * 0.1
    bo = jax.random.normal(k_bo, (osize,), dtype=jnp.float32) * 0.1

    ref = taught_self_attn_ref(iq, scores, wv, bv, wo, bo, num_head=num_head)

    # f32 path (single query tile, no V cache).
    out = jax.block_until_ready(
        taught_self_attn(iq, scores, wv, bv, wo, bo, num_head=num_head))
    assert out.shape == (B, N, osize)
    assert jnp.allclose(out, ref, atol=1e-4, rtol=1e-4), "f32 mismatch vs reference"

    # bf16 compute path (halved scores HBM traffic); looser tolerance for rounding.
    out_bf16 = jax.block_until_ready(
        taught_self_attn(iq, scores, wv, bv, wo, bo, num_head=num_head,
                         compute_dtype=jnp.bfloat16))
    assert jnp.allclose(out_bf16, ref, atol=5e-2, rtol=5e-2), "bf16 mismatch vs reference"

    # Multi-tile query axis with the persistent V cache (q axis "arbitrary").
    N2 = 16
    iq2 = jax.random.normal(k_iq, (B, N2, isize), dtype=jnp.float32)
    scores2 = jax.nn.softmax(
        jax.random.normal(k_sc, (B, num_head, N2, N2), dtype=jnp.float32), axis=-1)
    ref2 = taught_self_attn_ref(iq2, scores2, wv, bv, wo, bo, num_head=num_head)
    out2 = jax.block_until_ready(
        taught_self_attn(iq2, scores2, wv, bv, wo, bo, num_head=num_head,
                         query_tile=8))                     # cache_v auto -> True
    assert jnp.allclose(out2, ref2, atol=1e-4, rtol=1e-4), "cached-V path mismatch"

    # Same shapes with the cache disabled (both axes "parallel").
    out2b = jax.block_until_ready(
        taught_self_attn(iq2, scores2, wv, bv, wo, bo, num_head=num_head,
                         query_tile=8, cache_v=False))
    assert jnp.allclose(out2b, ref2, atol=1e-4, rtol=1e-4), "uncached-V path mismatch"

    print("KERNEL_OK")
</pallas_src>

<mosaic_0001>
module attributes {stable_mosaic.version = 11 : i64} {
  func.func @_taught_self_attn_kernel(%arg0: i32, %arg1: i32, %arg2: memref<1x8x32xf32, #tpu.memory_space<vmem>>, %arg3: memref<1x8x8x8xf32, #tpu.memory_space<vmem>>, %arg4: memref<32x32xf32, #tpu.memory_space<vmem>>, %arg5: memref<1x32xf32, #tpu.memory_space<vmem>>, %arg6: memref<32x32xf32, #tpu.memory_space<vmem>>, %arg7: memref<1x32xf32, #tpu.memory_space<vmem>>, %arg8: memref<1x8x32xf32, #tpu.memory_space<vmem>>) attributes {dimension_semantics = [#tpu.dimension_semantics<parallel>, #tpu.dimension_semantics<parallel>], iteration_bounds = array<i64: 2, 1>, scalar_prefetch = 0 : i64, scratch_operands = 0 : i64, tpu.core_type = #tpu.core_type<tc>, window_params = [{pipeline_mode = #tpu.pipeline_mode<synchronous>, transform_indices = @transform_0, window_bounds = array<i64: 1, 8, 32>}, {transform_indices = @transform_1, window_bounds = array<i64: 1, 8, 8, 8>}, {pipeline_mode = #tpu.pipeline_mode<synchronous>, transform_indices = @transform_2, window_bounds = array<i64: 32, 32>}, {pipeline_mode = #tpu.pipeline_mode<synchronous>, transform_indices = @transform_3, window_bounds = array<i64: 1, 32>}, {pipeline_mode = #tpu.pipeline_mode<synchronous>, transform_indices = @transform_4, window_bounds = array<i64: 32, 32>}, {pipeline_mode = #tpu.pipeline_mode<synchronous>, transform_indices = @transform_5, window_bounds = array<i64: 1, 32>}, {transform_indices = @transform_6, window_bounds = array<i64: 1, 8, 32>}]} {
    %c0 = arith.constant 0 : index
    %c0_0 = arith.constant 0 : index
    %c0_1 = arith.constant 0 : index
    %0 = vector.load %arg2[%c0, %c0_0, %c0_1] : memref<1x8x32xf32, #tpu.memory_space<vmem>>, vector<1x8x32xf32>
    %1 = vector.shape_cast %0 : vector<1x8x32xf32> to vector<8x32xf32>
    %c0_2 = arith.constant 0 : index
    %c0_3 = arith.constant 0 : index
    %2 = vector.load %arg4[%c0_2, %c0_3] : memref<32x32xf32, #tpu.memory_space<vmem>>, vector<32x32xf32>
    %cst = arith.constant dense<0.000000e+00> : vector<8x32xf32>
    %3 = tpu.matmul %1, %2, %cst {dimension_numbers = #tpu.dot_dimension_numbers<[1], [0], [0], [1], [0, 0, 1, 1], [], []>} : vector<8x32xf32>, vector<32x32xf32>, vector<8x32xf32> -> vector<8x32xf32>
    %c0_4 = arith.constant 0 : index
    %c0_5 = arith.constant 0 : index
    %4 = vector.load %arg5[%c0_4, %c0_5] : memref<1x32xf32, #tpu.memory_space<vmem>>, vector<1x32xf32>
    %5 = vector.broadcast %4 : vector<1x32xf32> to vector<8x32xf32>
    %6 = arith.addf %3, %5 : vector<8x32xf32>
    %c0_6 = arith.constant 0 : index
    %c0_7 = arith.constant 0 : index
    %7 = vector.load %arg6[%c0_6, %c0_7] : memref<32x32xf32, #tpu.memory_space<vmem>>, vector<32x32xf32>
    %c0_8 = arith.constant 0 : index
    %c0_9 = arith.constant 0 : index
    %c0_10 = arith.constant 0 : index
    %c0_11 = arith.constant 0 : index
    %8 = vector.load %arg3[%c0_8, %c0_9, %c0_10, %c0_11] : memref<1x8x8x8xf32, #tpu.memory_space<vmem>>, vector<1x1x8x8xf32>
    %9 = vector.shape_cast %8 : vector<1x1x8x8xf32> to vector<8x8xf32>
    %10 = vector.extract_strided_slice %6 {offsets = [0, 0], sizes = [8, 4], strides = [1, 1]} : vector<8x32xf32> to vector<8x4xf32>
    %cst_12 = arith.constant dense<0.000000e+00> : vector<8x4xf32>
    %11 = tpu.matmul %9, %10, %cst_12 {dimension_numbers = #tpu.dot_dimension_numbers<[1], [0], [0], [1], [0, 0, 1, 1], [], []>} : vector<8x8xf32>, vector<8x4xf32>, vector<8x4xf32> -> vector<8x4xf32>
    %12 = vector.extract_strided_slice %7 {offsets = [0, 0], sizes = [4, 32], strides = [1, 1]} : vector<32x32xf32> to vector<4x32xf32>
    %cst_13 = arith.constant dense<0.000000e+00> : vector<8x32xf32>
    %13 = tpu.matmul %11, %12, %cst_13 {dimension_numbers = #tpu.dot_dimension_numbers<[1], [0], [0], [1], [0, 0, 1, 1], [], []>} : vector<8x4xf32>, vector<4x32xf32>, vector<8x32xf32> -> vector<8x32xf32>
    %c0_14 = arith.constant 0 : index
    %c1 = arith.constant 1 : index
    %c0_15 = arith.constant 0 : index
    %c0_16 = arith.constant 0 : index
    %14 = vector.load %arg3[%c0_14, %c1, %c0_15, %c0_16] : memref<1x8x8x8xf32, #tpu.memory_space<vmem>>, vector<1x1x8x8xf32>
    %15 = vector.shape_cast %14 : vector<1x1x8x8xf32> to vector<8x8xf32>
    %16 = vector.extract_strided_slice %6 {offsets = [0, 4], sizes = [8, 4], strides = [1, 1]} : vector<8x32xf32> to vector<8x4xf32>
    %cst_17 = arith.constant dense<0.000000e+00> : vector<8x4xf32>
    %17 = tpu.matmul %15, %16, %cst_17 {dimension_numbers = #tpu.dot_dimension_numbers<[1], [0], [0], [1], [0, 0, 1, 1], [], []>} : vector<8x8xf32>, vector<8x4xf32>, vector<8x4xf32> -> vector<8x4xf32>
    %18 = vector.extract_strided_slice %7 {offsets = [4, 0], sizes = [4, 32], strides = [1, 1]} : vector<32x32xf32> to vector<4x32xf32>
    %cst_18 = arith.constant dense<0.000000e+00> : vector<8x32xf32>
    %19 = tpu.matmul %17, %18, %cst_18 {dimension_numbers = #tpu.dot_dimension_numbers<[1], [0], [0], [1], [0, 0, 1, 1], [], []>} : vector<8x4xf32>, vector<4x32xf32>, vector<8x32xf32> -> vector<8x32xf32>
    %20 = arith.addf %13, %19 : vector<8x32xf32>
    %c0_19 = arith.constant 0 : index
    %c2 = arith.constant 2 : index
    %c0_20 = arith.constant 0 : index
    %c0_21 = arith.constant 0 : index
    %21 = vector.load %arg3[%c0_19, %c2, %c0_20, %c0_21] : memref<1x8x8x8xf32, #tpu.memory_space<vmem>>, vector<1x1x8x8xf32>
    %22 = vector.shape_cast %21 : vector<1x1x8x8xf32> to vector<8x8xf32>
    %23 = vector.extract_strided_slice %6 {offsets = [0, 8], sizes = [8, 4], strides = [1, 1]} : vector<8x32xf32> to vector<8x4xf32>
    %cst_22 = arith.constant dense<0.000000e+00> : vector<8x4xf32>
    %24 = tpu.matmul %22, %23, %cst_22 {dimension_numbers = #tpu.dot_dimension_numbers<[1], [0], [0], [1], [0, 0, 1, 1], [], []>} : vector<8x8xf32>, vector<8x4xf32>, vector<8x4xf32> -> vector<8x4xf32>
    %25 = vector.extract_strided_slice %7 {offsets = [8, 0], sizes = [4, 32], strides = [1, 1]} : vector<32x32xf32> to vector<4x32xf32>
    %cst_23 = arith.constant dense<0.000000e+00> : vector<8x32xf32>
    %26 = tpu.matmul %24, %25, %cst_23 {dimension_numbers = #tpu.dot_dimension_numbers<[1], [0], [0], [1], [0, 0, 1, 1], [], []>} : vector<8x4xf32>, vector<4x32xf32>, vector<8x32xf32> -> vector<8x32xf32>
    %27 = arith.addf %20, %26 : vector<8x32xf32>
    %c0_24 = arith.constant 0 : index
    %c3 = arith.constant 3 : index
    %c0_25 = arith.constant 0 : index
    %c0_26 = arith.constant 0 : index
    %28 = vector.load %arg3[%c0_24, %c3, %c0_25, %c0_26] : memref<1x8x8x8xf32, #tpu.memory_space<vmem>>, vector<1x1x8x8xf32>
    %29 = vector.shape_cast %28 : vector<1x1x8x8xf32> to vector<8x8xf32>
    %30 = vector.extract_strided_slice %6 {offsets = [0, 12], sizes = [8, 4], strides = [1, 1]} : vector<8x32xf32> to vector<8x4xf32>
    %cst_27 = arith.constant dense<0.000000e+00> : vector<8x4xf32>
    %31 = tpu.matmul %29, %30, %cst_27 {dimension_numbers = #tpu.dot_dimension_numbers<[1], [0], [0], [1], [0, 0, 1, 1], [], []>} : vector<8x8xf32>, vector<8x4xf32>, vector<8x4xf32> -> vector<8x4xf32>
    %32 = vector.extract_strided_slice %7 {offsets = [12, 0], sizes = [4, 32], strides = [1, 1]} : vector<32x32xf32> to vector<4x32xf32>
    %cst_28 = arith.constant dense<0.000000e+00> : vector<8x32xf32>
    %33 = tpu.matmul %31, %32, %cst_28 {dimension_numbers = #tpu.dot_dimension_numbers<[1], [0], [0], [1], [0, 0, 1, 1], [], []>} : vector<8x4xf32>, vector<4x32xf32>, vector<8x32xf32> -> vector<8x32xf32>
    %34 = arith.addf %27, %33 : vector<8x32xf32>
    %c0_29 = arith.constant 0 : index
    %c4 = arith.constant 4 : index
    %c0_30 = arith.constant 0 : index
    %c0_31 = arith.constant 0 : index
    %35 = vector.load %arg3[%c0_29, %c4, %c0_30, %c0_31] : memref<1x8x8x8xf32, #tpu.memory_space<vmem>>, vector<1x1x8x8xf32>
    %36 = vector.shape_cast %35 : vector<1x1x8x8xf32> to vector<8x8xf32>
    %37 = vector.extract_strided_slice %6 {offsets = [0, 16], sizes = [8, 4], strides = [1, 1]} : vector<8x32xf32> to vector<8x4xf32>
    %cst_32 = arith.constant dense<0.000000e+00> : vector<8x4xf32>
    %38 = tpu.matmul %36, %37, %cst_32 {dimension_numbers = #tpu.dot_dimension_numbers<[1], [0], [0], [1], [0, 0, 1, 1], [], []>} : vector<8x8xf32>, vector<8x4xf32>, vector<8x4xf32> -> vector<8x4xf32>
    %39 = vector.extract_strided_slice %7 {offsets = [16, 0], sizes = [4, 32], strides = [1, 1]} : vector<32x32xf32> to vector<4x32xf32>
    %cst_33 = arith.constant dense<0.000000e+00> : vector<8x32xf32>
    %40 = tpu.matmul %38, %39, %cst_33 {dimension_numbers = #tpu.dot_dimension_numbers<[1], [0], [0], [1], [0, 0, 1, 1], [], []>} : vector<8x4xf32>, vector<4x32xf32>, vector<8x32xf32> -> vector<8x32xf32>
    %41 = arith.addf %34, %40 : vector<8x32xf32>
    %c0_34 = arith.constant 0 : index
    %c5 = arith.constant 5 : index
    %c0_35 = arith.constant 0 : index
    %c0_36 = arith.constant 0 : index
    %42 = vector.load %arg3[%c0_34, %c5, %c0_35, %c0_36] : memref<1x8x8x8xf32, #tpu.memory_space<vmem>>, vector<1x1x8x8xf32>
    %43 = vector.shape_cast %42 : vector<1x1x8x8xf32> to vector<8x8xf32>
    %44 = vector.extract_strided_slice %6 {offsets = [0, 20], sizes = [8, 4], strides = [1, 1]} : vector<8x32xf32> to vector<8x4xf32>
    %cst_37 = arith.constant dense<0.000000e+00> : vector<8x4xf32>
    %45 = tpu.matmul %43, %44, %cst_37 {dimension_numbers = #tpu.dot_dimension_numbers<[1], [0], [0], [1], [0, 0, 1, 1], [], []>} : vector<8x8xf32>, vector<8x4xf32>, vector<8x4xf32> -> vector<8x4xf32>
    %46 = vector.extract_strided_slice %7 {offsets = [20, 0], sizes = [4, 32], strides = [1, 1]} : vector<32x32xf32> to vector<4x32xf32>
    %cst_38 = arith.constant dense<0.000000e+00> : vector<8x32xf32>
    %47 = tpu.matmul %45, %46, %cst_38 {dimension_numbers = #tpu.dot_dimension_numbers<[1], [0], [0], [1], [0, 0, 1, 1], [], []>} : vector<8x4xf32>, vector<4x32xf32>, vector<8x32xf32> -> vector<8x32xf32>
    %48 = arith.addf %41, %47 : vector<8x32xf32>
    %c0_39 = arith.constant 0 : index
    %c6 = arith.constant 6 : index
    %c0_40 = arith.constant 0 : index
    %c0_41 = arith.constant 0 : index
    %49 = vector.load %arg3[%c0_39, %c6, %c0_40, %c0_41] : memref<1x8x8x8xf32, #tpu.memory_space<vmem>>, vector<1x1x8x8xf32>
    %50 = vector.shape_cast %49 : vector<1x1x8x8xf32> to vector<8x8xf32>
    %51 = vector.extract_strided_slice %6 {offsets = [0, 24], sizes = [8, 4], strides = [1, 1]} : vector<8x32xf32> to vector<8x4xf32>
    %cst_42 = arith.constant dense<0.000000e+00> : vector<8x4xf32>
    %52 = tpu.matmul %50, %51, %cst_42 {dimension_numbers = #tpu.dot_dimension_numbers<[1], [0], [0], [1], [0, 0, 1, 1], [], []>} : vector<8x8xf32>, vector<8x4xf32>, vector<8x4xf32> -> vector<8x4xf32>
    %53 = vector.extract_strided_slice %7 {offsets = [24, 0], sizes = [4, 32], strides = [1, 1]} : vector<32x32xf32> to vector<4x32xf32>
    %cst_43 = arith.constant dense<0.000000e+00> : vector<8x32xf32>
    %54 = tpu.matmul %52, %53, %cst_43 {dimension_numbers = #tpu.dot_dimension_numbers<[1], [0], [0], [1], [0, 0, 1, 1], [], []>} : vector<8x4xf32>, vector<4x32xf32>, vector<8x32xf32> -> vector<8x32xf32>
    %55 = arith.addf %48, %54 : vector<8x32xf32>
    %c0_44 = arith.constant 0 : index
    %c7 = arith.constant 7 : index
    %c0_45 = arith.constant 0 : index
    %c0_46 = arith.constant 0 : index
    %56 = vector.load %arg3[%c0_44, %c7, %c0_45, %c0_46] : memref<1x8x8x8xf32, #tpu.memory_space<vmem>>, vector<1x1x8x8xf32>
    %57 = vector.shape_cast %56 : vector<1x1x8x8xf32> to vector<8x8xf32>
    %58 = vector.extract_strided_slice %6 {offsets = [0, 28], sizes = [8, 4], strides = [1, 1]} : vector<8x32xf32> to vector<8x4xf32>
    %cst_47 = arith.constant dense<0.000000e+00> : vector<8x4xf32>
    %59 = tpu.matmul %57, %58, %cst_47 {dimension_numbers = #tpu.dot_dimension_numbers<[1], [0], [0], [1], [0, 0, 1, 1], [], []>} : vector<8x8xf32>, vector<8x4xf32>, vector<8x4xf32> -> vector<8x4xf32>
    %60 = vector.extract_strided_slice %7 {offsets = [28, 0], sizes = [4, 32], strides = [1, 1]} : vector<32x32xf32> to vector<4x32xf32>
    %cst_48 = arith.constant dense<0.000000e+00> : vector<8x32xf32>
    %61 = tpu.matmul %59, %60, %cst_48 {dimension_numbers = #tpu.dot_dimension_numbers<[1], [0], [0], [1], [0, 0, 1, 1], [], []>} : vector<8x4xf32>, vector<4x32xf32>, vector<8x32xf32> -> vector<8x32xf32>
    %62 = arith.addf %55, %61 : vector<8x32xf32>
    %c0_49 = arith.constant 0 : index
    %c0_50 = arith.constant 0 : index
    %63 = vector.load %arg7[%c0_49, %c0_50] : memref<1x32xf32, #tpu.memory_space<vmem>>, vector<1x32xf32>
    %64 = vector.broadcast %63 : vector<1x32xf32> to vector<8x32xf32>
    %65 = arith.addf %62, %64 : vector<8x32xf32>
    %c0_51 = arith.constant 0 : index
    %c0_52 = arith.constant 0 : index
    %c0_53 = arith.constant 0 : index
    %66 = vector.load %arg8[%c0_51, %c0_52, %c0_53] : memref<1x8x32xf32, #tpu.memory_space<vmem>>, vector<1x8x32xf32>
    %67 = vector.shape_cast %66 : vector<1x8x32xf32> to vector<8x32xf32>
    %68 = vector.shape_cast %65 : vector<8x32xf32> to vector<1x8x32xf32>
    tpu.vector_store %arg8[%c0_51, %c0_52, %c0_53], %68 {strides = array<i32>} : memref<1x8x32xf32, #tpu.memory_space<vmem>>, vector<1x8x32xf32>,
    return
  }
  func.func @transform_0(%arg0: i32, %arg1: i32) -> (i32, i32, i32) {
    %c0_i32 = arith.constant 0 : i32
    %c0_i32_0 = arith.constant 0 : i32
    %c0_i32_1 = arith.constant 0 : i32
    return %arg0, %c0_i32, %c0_i32_0 : i32, i32, i32
  }
  func.func @transform_1(%arg0: i32, %arg1: i32) -> (i32, i32, i32, i32) {
    %c0_i32 = arith.constant 0 : i32
    %c0_i32_0 = arith.constant 0 : i32
    %c0_i32_1 = arith.constant 0 : i32
    return %arg0, %c0_i32, %arg1, %c0_i32_0 : i32, i32, i32, i32
  }
  func.func @transform_2(%arg0: i32, %arg1: i32) -> (i32, i32) {
    %c0_i32 = arith.constant 0 : i32
    %c0_i32_0 = arith.constant 0 : i32
    %c0_i32_1 = arith.constant 0 : i32
    return %c0_i32, %c0_i32_0 : i32, i32
  }
  func.func @transform_3(%arg0: i32, %arg1: i32) -> (i32, i32) {
    %c0_i32 = arith.constant 0 : i32
    %c0_i32_0 = arith.constant 0 : i32
    %c0_i32_1 = arith.constant 0 : i32
    return %c0_i32, %c0_i32_0 : i32, i32
  }
  func.func @transform_4(%arg0: i32, %arg1: i32) -> (i32, i32) {
    %c0_i32 = arith.constant 0 : i32
    %c0_i32_0 = arith.constant 0 : i32
    %c0_i32_1 = arith.constant 0 : i32
    return %c0_i32, %c0_i32_0 : i32, i32
  }
  func.func @transform_5(%arg0: i32, %arg1: i32) -> (i32, i32) {
    %c0_i32 = arith.constant 0 : i32
    %c0_i32_0 = arith.constant 0 : i32
    %c0_i32_1 = arith.constant 0 : i32
    return %c0_i32, %c0_i32_0 : i32, i32
  }
  func.func @transform_6(%arg0: i32, %arg1: i32) -> (i32, i32, i32) {
    %c0_i32 = arith.constant 0 : i32
    %c0_i32_0 = arith.constant 0 : i32
    return %arg0, %arg1, %c0_i32 : i32, i32, i32
  }
}

</mosaic_0001>

<bundles_post_ra>
// kernel: tpu_custom_call.1
= control target key start
LH: loop header
LB: loop body
LE: loop exit
PB: predicated region body
PF: predicated region fallthrough
CT: control target
= control target key end

     0   :  { %s2748_s0 = inlined_call_operand.hbm [shape: f32[2,8,32], index: 0, kind: input, shape index: {}]   ;;  %s2749_s1 = inlined_call_operand.hbm [shape: f32[2,8,8,8], index: 1, kind: input, shape index: {}]   ;;  %s2750_s2 = inlined_call_operand.hbm [shape: f32[32,32], index: 2, kind: input, shape index: {}]   ;;  %s2751_s3 = inlined_call_operand.vmem [shape: f32[1,32], index: 3, kind: input, shape index: {}]   ;;  %s2752_s4 = inlined_call_operand.hbm [shape: f32[32,32], index: 4, kind: input, shape index: {}]   ;;  %s2753_s5 = inlined_call_operand.vmem [shape: f32[1,32], index: 5, kind: input, shape index: {}]   ;;  %s2754_s6 = inlined_call_operand.hbm [shape: f32[2,8,32], index: 6, kind: output, shape index: {}]  }
   0x1   :  { %2771 = sst [smem:[#allocation16_spill]] %s2748_s0 }
   0x2   :  { %2772 = sst [smem:[#allocation17_spill]] %s2750_s2 }
   0x3   :  { %2773 = sst [smem:[#allocation18_spill]] %s2752_s4 }
   0x4   :  { %11 = vsyncpa [#allocation3], 0 }
   0x5   :  { %12 = vsyncpa [#allocation6], 0 }
   0x6   :  { %14 = vsyncpa [#allocation6 + $0x1], 0 }
   0x7   :  { %15 = vsyncpa [#allocation9], 0 }
   0x8   :  { %16 = vsyncpa [#allocation4], 0 }
   0x9   :  { %18 = vsyncpa [#allocation4 + $0x1], 0  ;;  %s2355_s21 = smov 0   ;;  %s2357_s22 = smov 0  }
   0xa   :  { %s2359_s23 = smov 0   ;;  %s2361_s24 = smov 0  }
   0xb   :  { %s2363_s25 = smov 0   ;;  %s2365_s26 = smov 0  }
   0xc LB: > { %s2303_s27 = smov [#allocation7]   ;;  %s2386_s29 = sadd.s32 4294967295, %s2301_s26   ;;  %s2301_s26 = sphi %s2365_s26, %s24_s26   ;;  %s2297_s25 = sphi %s2363_s25, %s2812_s25   ;;  %s2293_s24 = sphi %s2361_s24, %s2811_s24   ;;  %s2289_s23 = sphi %s2359_s23, %s2810_s23   ;;  %s2285_s22 = sphi %s2357_s22, %s2809_s22   ;;  %s2281_s21 = sphi %s2355_s21, %s2808_s21  }
   0xd   : > { %s232_s28 = sshll.u32 %s2303_s27, 4  ;;  %p1804_p0 = scmp.ge.s32.totalorder %s2301_s26, 1  ;;  %s233_s28 = int_to_ptr.vmem [resolvable:$true] %s232_s28 }
   0xe   : > { %p2756_p1 = scmp.eq.s32.totalorder %s2386_s29, 0  ;;  %p207_p2 = scmp.lt.s32.totalorder %s2301_s26, 3 }
   0xf   : > { %s2776_s2 = sld [smem:[#allocation17_spill]] }
  0x10   : > { %p2391_p3 = pnand %p1804_p0, %p207_p2 }
  0x12   : > { %s2774_s30 = scalar_select %p2391_p3, 1, 0 }
  0x13   : > { %p2755_p5 = pneg %p2391_p3 }
  0x15   : > { %p2403_p6 = pnand %p2755_p5, %p2756_p1  ;;  %s2091_s10 = scalar_lea.hbm %s2776_s2, 512 }
  0x16   : > { %p2092_p7 = scmp.ne.s32.totalorder %s2776_s2, %s2091_s10  ;;  %p2098_p11 = scmp.lt.u32.totalorder %s2091_s10, %s2776_s2 }
  0x17   : > { %s2775_s7 = scalar_select %p2403_p6, 1, 0 }
  0x18   : > { %p2762_p8 = pneg %p2403_p6 }
  0x1a   : > { %p2094_p9 = pnand %p2762_p8, %p2092_p7 }
  0x1c   : > { %p2095_p10 = pneg %p2094_p9 }
  0x1e   : > { %p2100_p12 = pnand %p2098_p11, %p2095_p10 }
  0x20   : > { %2103 = shalt.err (!%p2100_p12)
}
  0x21   : > { %s2104_s15 = scalar_lea.vmem %s233_s28, 512  ;;  %p2112_p4 = scmp.lt.s32.totalorder %s233_s28, %s233_s28 }
  0x22   : > { %p2105_p13 = scmp.ne.s32.totalorder %s233_s28, %s2104_s15  ;;  %p2113_p5 = scmp.lt.s32.totalorder %s2104_s15, %s2104_s15 }
  0x24   : > { %p2107_p0 = pnand %p2105_p13, %p2762_p8  ;;  %p2114_p1 = por %p2113_p5, %p2112_p4 }
  0x26   : > { %p2108_p2 = pneg %p2107_p0 }
  0x28   : > { %p2115_p3 = pnand %p2114_p1, %p2108_p2 }
  0x2a   : > { %2118 = shalt.err (!%p2115_p3)
}
  0x2b   : > { %s2760_s16 = smov 128   ;;  %s2768_s17 = smov 8  }
  0x2c   : > { %2010 = dma.hbm_to_vmem [thread:$0]  (!%p2403_p6), %s2776_s2, 512, %s233_s28, [#allocation6], %s2760_s16, %s2760_s16, %s2768_s17  }
  0x2d   : > { %s1803_s20 = sadd.s32 4294967294, %s2301_s26   ;;  %p56_p1 = scmp.ne.s32.totalorder %s2285_s22, %s2281_s21 }
  0x2e   : > { %p78_p3 = scmp.ne.s32.totalorder %s2289_s23, %s2285_s22  ;;  %p79_p4 = scmp.eq.s32.totalorder %s2301_s26, 0 }
  0x2f   : > { %p2777_p5 = scmp.eq.s32.totalorder %s2386_s29, 0  ;;  %p194_p9 = scmp.eq.s32.totalorder %s2386_s29, 1 }
  0x30   : > { %p2446_p10 = por %p79_p4, %p78_p3  ;;  %p200_p11 = scmp.eq.s32.totalorder %s1803_s20, 1 }
  0x31   : > { %p2441_p7 = por %p2777_p5, %p56_p1  ;;  %p2450_p12 = por %p194_p9, %p78_p3 }
  0x32   : > { %s2779_s9 = scalar_select %p2446_p10, 1, 0 }
  0x33   : > { %s2778_s8 = scalar_select %p2441_p7, 1, 0 }
  0x34   : > { %s2780_s28 = scalar_select %p2450_p12, 1, 0 }
  0x35   : > { %s2759_s10 = sshll.u32 %s2293_s24, 7  ;;  %p2455_p13 = por %p200_p11, %p56_p1 }
  0x36   : > { %s2782_s0 = sld [smem:[#allocation16_spill]]  ;;  %p2783_p0 = scmp.ne.s32.totalorder %s2774_s30, 0 }
  0x37   : > { %s2781_s11 = scalar_select %p2455_p13, 1, 0 }
  0x38   : > { %p2784_p2 = pneg %p2783_p0  ;;  %s2306_s18 = smov [#allocation2]  }
  0x39   : > { %s222_s19 = sshll.u32 %s2306_s18, 4  ;;  %s223_s19 = int_to_ptr.vmem [resolvable:$true] %s222_s19 }
  0x3a   : > { %p2469_p4 = pnand %p2784_p2, %p2441_p7 }
  0x3c   : > { %s220_s14 = scalar_lea.hbm %s2782_s0, %s2759_s10  ;;  %p2121_p5 = pneg %p2469_p4 }
  0x3d   : > { %s2119_s20 = scalar_lea.hbm %s220_s14, 128  ;;  %s2124_s10 = scalar_lea.hbm %s2782_s0, 256 }
  0x3e   : > { %p2120_p3 = scmp.ne.s32.totalorder %s220_s14, %s2119_s20  ;;  %p2125_p2 = scmp.lt.u32.totalorder %s220_s14, %s2782_s0 }
  0x3f   : > { %p2126_p8 = scmp.lt.u32.totalorder %s2124_s10, %s2119_s20  ;;  %p2128_p1 = scmp.lt.u32.totalorder %s2119_s20, %s220_s14 }
  0x40   : > { %p2122_p9 = pnand %p2121_p5, %p2120_p3 }
  0x41   : > { %p2127_p13 = por %p2126_p8, %p2125_p2 }
  0x42   : > { %p2123_p11 = pneg %p2122_p9 }
  0x43   : > { %p2129_p12 = por %p2128_p1, %p2127_p13 }
  0x45   : > { %p2130_p7 = pnand %p2129_p12, %p2123_p11 }
  0x47   : > { %2133 = shalt.err (!%p2130_p7)
}
  0x48   : > { %s2134_s18 = scalar_lea.vmem %s223_s19, 128  ;;  %p2142_p6 = scmp.lt.s32.totalorder %s223_s19, %s223_s19 }
  0x49   : > { %p2135_p0 = scmp.ne.s32.totalorder %s223_s19, %s2134_s18  ;;  %p2143_p10 = scmp.lt.s32.totalorder %s2134_s18, %s2134_s18 }
  0x4b   : > { %p2137_p3 = pnand %p2135_p0, %p2121_p5  ;;  %p2144_p2 = por %p2143_p10, %p2142_p6 }
  0x4d   : > { %p2138_p9 = pneg %p2137_p3 }
  0x4f   : > { %p2145_p8 = pnand %p2144_p2, %p2138_p9 }
  0x51   : > { %2148 = shalt.err (!%p2145_p8)
}
  0x52   : > { %2007 = dma.hbm_to_vmem [thread:$0]  (!%p2469_p4), %s220_s14, 128, %s223_s19, [#allocation3]  }
  0x53   : > { %p2786_p12 = scmp.ne.s32.totalorder %s2779_s9, 0  ;;  %p2787_p7 = scmp.lt.s32.totalorder %s2301_s26, 2 }
  0x54   : > { %s2307_s27 = smov [#allocation8]   ;;  %s2789_s4 = sld [smem:[#allocation18_spill]] }
  0x55   : > { %p2494_p13 = pnand %p2787_p7, %p2786_p12  ;;  %s248_s10 = sshll.u32 %s2307_s27, 4  ;;  %s249_s10 = int_to_ptr.vmem [resolvable:$true] %s248_s10 }
  0x56   : > { %p2790_p10 = scmp.ne.s32.totalorder %s2775_s7, 0 }
  0x57   : > { %s2788_s16 = scalar_select %p2494_p13, 1, 0 }
  0x58   : > { %p2791_p0 = pneg %p2790_p10 }
  0x5a   : > { %s2149_s13 = scalar_lea.hbm %s2789_s4, 512 }
  0x5b   : > { %p2150_p6 = scmp.ne.s32.totalorder %s2789_s4, %s2149_s13  ;;  %p2156_p5 = scmp.lt.u32.totalorder %s2149_s13, %s2789_s4 }
  0x5d   : > { %p2152_p4 = pnand %p2150_p6, %p2791_p0 }
  0x5f   : > { %p2153_p1 = pneg %p2152_p4 }
  0x61   : > { %p2158_p11 = pnand %p2156_p5, %p2153_p1 }
  0x63   : > { %2161 = shalt.err (!%p2158_p11)
}
  0x64   : > { %s2162_s15 = scalar_lea.vmem %s249_s10, 512  ;;  %p2792_p9 = pmov %p2791_p0 }
  0x65   : > { %p2163_p3 = scmp.ne.s32.totalorder %s249_s10, %s2162_s15  ;;  %p2170_p12 = scmp.lt.s32.totalorder %s249_s10, %s249_s10 }
  0x66   : > { %p2171_p7 = scmp.lt.s32.totalorder %s2162_s15, %s2162_s15 }
  0x67   : > { %p2165_p2 = pnand %p2163_p3, %p2792_p9 }
  0x68   : > { %p2172_p13 = por %p2171_p7, %p2170_p12 }
  0x69   : > { %p2166_p8 = pneg %p2165_p2 }
  0x6b   : > { %p2173_p0 = pnand %p2172_p13, %p2166_p8 }
  0x6d   : > { %2176 = shalt.err (!%p2173_p0)
}
  0x6e   : > { %s2793_s17 = smov 8   ;;  %s2794_s19 = smov 128  }
  0x6f   : > { %2013 = dma.hbm_to_vmem [thread:$0]  (!%p2790_p10), %s2789_s4, 512, %s249_s10, [#allocation9], %s2794_s19, %s2794_s19, %s2793_s17  }
  0x70   : > { %s265_s12 = sand.u32 1, %s2301_s26   ;;  %s36_s13 = sadd.s32 1, %s2297_s25 }
  0x71   : > { %p38_p13 = scmp.ge.s32.totalorder %s36_s13, 2  ;;  %s267_s18 = sand.u32 1, %s2289_s23  }
  0x72   : > { %s1809_s9 = sshll.u32 %s267_s18, 6  ;;  %s1855_s7 = sshll.u32 %s2297_s25, 10 }
  0x73   : > { %s2814_s13 = smov (%p38_p13, %s36_s13), 0  ;;  %s2530_s27 = scalar_lea.hbm %s2749_s1, %s1855_s7 }
  0x74   : > { %s40_s10 = ssub.s32 %s2297_s25, %s2814_s13  ;;  %s269_s20 = scalar_lea.vmem [#allocation5], %s1809_s9 }
  0x75   : > { %s277_s0 = sshll.u32 %s269_s20, 4  ;;  %p2534_p6 = scmp.eq.s32.totalorder %s40_s10, 0  ;;  %s2538_s0 = int_to_ptr.vmem [resolvable:$true] %s277_s0 }
  0x76   : > { %s2540_s18 = scalar_lea.sflag [#allocation6], %s265_s12  ;;  %s2177_s4 = scalar_lea.hbm %s2530_s27, 1024 }
  0x77   : > { %p2178_p10 = scmp.ne.s32.totalorder %s2530_s27, %s2177_s4  ;;  %p2796_p4 = scmp.ne.s32.totalorder %s2788_s16, 0 }
  0x78   : > { %s2182_s9 = scalar_lea.hbm %s2749_s1, 2048  ;;  %p2183_p3 = scmp.lt.u32.totalorder %s2530_s27, %s2749_s1 }
  0x79   : > { %p2179_p1 = pneg %p2796_p4  ;;  %p2184_p9 = scmp.lt.u32.totalorder %s2182_s9, %s2177_s4 }
  0x7a   : > { %p2186_p8 = scmp.lt.u32.totalorder %s2177_s4, %s2530_s27 }
  0x7b   : > { %p2180_p5 = pnand %p2179_p1, %p2178_p10  ;;  %p2185_p2 = por %p2184_p9, %p2183_p3 }
  0x7d   : > { %p2181_p11 = pneg %p2180_p5  ;;  %p2187_p12 = por %p2186_p8, %p2185_p2 }
  0x7f   : > { %p2188_p7 = pnand %p2187_p12, %p2181_p11 }
  0x81   : > { %2191 = shalt.err (!%p2188_p7)
}
  0x82   : > { %s2192_s12 = scalar_lea.vmem %s2538_s0, 1024  ;;  %s2308_s20 = smov [#allocation5]  }
  0x83   : > { %p2193_p0 = scmp.ne.s32.totalorder %s2538_s0, %s2192_s12  ;;  %s2197_s7 = sshll.u32 %s2308_s20, 4  ;;  %s2198_s7 = int_to_ptr.vmem [resolvable:$false] %s2197_s7 }
  0x84   : > { %s2199_s14 = scalar_lea.vmem %s2198_s7, 2048  ;;  %p2200_p5 = scmp.lt.s32.totalorder %s2538_s0, %s2198_s7 }
  0x85   : > { %p2195_p13 = pnand %p2193_p0, %p2179_p1  ;;  %p2201_p3 = scmp.lt.s32.totalorder %s2199_s14, %s2192_s12 }
  0x87   : > { %p2196_p10 = pneg %p2195_p13  ;;  %p2202_p9 = por %p2201_p3, %p2200_p5 }
  0x89   : > { %p2203_p2 = pnand %p2202_p9, %p2196_p10 }
  0x8b   : > { %2206 = shalt.err (!%p2203_p2)
}
  0x8c   : > { %2017 = dma.hbm_to_vmem [thread:$0]  (!%p2796_p4), %s2530_s27, 1024, %s2538_s0, %s2540_s18, %s2794_s19, %s2794_s19, %s2793_s17  }
  0x8d   : > { %s2797_s4 = sadd.s32 1, %s2289_s23  ;;  %p2798_p1 = scmp.ne.s32.totalorder %s2774_s30, 0 }
  0x8e   : > { %s2576_s9 = scalar_select %p2534_p6, %s2289_s23, %s2797_s4  }
  0x8f   : > { %289 = sbr.rel (%p2798_p1) target bundleno = 1181 (0x49d), region = 44  ;;  %p2799_p11 = scmp.ne.s32.totalorder (!%p2798_p1), %s2778_s8, 0 }
  0x96   : > { %2260 = dma.done.wait (%p2799_p11), [#allocation3], 128  }
  0x97   : > { %2262 = vsyncadd (%p2799_p11), [#allocation3], 4294967168  ;;  %s295_s16 = sand.u32 1, %s2386_s29   ;;  %s2586_s15 = sand.u32 1, %s2285_s22  }
  0x98   : > { %s1813_s0 = sshll.u32 %s2586_s15, 6  ;;  %s296_s2 = scalar_lea.sflag [#allocation6], %s295_s16 }
  0x99   : > { %s2589_s17 = scalar_lea.vmem [#allocation5], %s1813_s0 }
  0x9a   : > { %2264 = dma.done.wait (%p2799_p11), %s296_s2, 1024  }
  0x9b   : > { %2266 = vsyncadd (%p2799_p11), %s296_s2, 4294966272  ;;  %p2800_p6 = scmp.eq.s32.totalorder %s2386_s29, 0 }
  0x9d   : > { %2268 = dma.done.wait (%p2800_p6), [#allocation6], 512   ;;  %p2801_p4 = pmov %p2800_p6 }
  0x9f   : > { %2270 = vsyncadd (%p2801_p4), [#allocation6], 4294966784  ;;  %p2802_p8 = pmov %p2801_p4 }
  0xa0   : > { %p2803_p12 = pmov %p2801_p4 }
  0xa1   : > { %2272 = dma.done.wait (%p2802_p8), [#allocation9], 512  }
  0xa2   : > { %2274 = vsyncadd (%p2803_p12), [#allocation9], 4294966784  ;;  %v2309_v0 = vmov 0.0|0.0   ;;  %vm2310_vm0 = vmmov 0   ;;  %v2311_v1 = vmov 0.0   ;;  %v337_v2 = vld [vmem:[#allocation7] sm:$0xff] }
  0xa3   : > { %1984 = vmatprep.subr.bf16.mxu0 %v2309_v0  ;;  %1901 = vmatprep.mubr.msk.f32.mxu0 %vm2310_vm0, %v2311_v1  ;;  %v338_v3 = vld [vmem:[#allocation7 + $0x8] sm:$0xff]  ;;  %v339_v4 = vld [vmem:[#allocation7 + $0x10] sm:$0xff]  ;;  %v340_v6 = vld [vmem:[#allocation7 + $0x18] sm:$0xff]  ;;  %vm348_vm1 = vcmask 261120   ;;  %vm427_vm2 = vcmask 64512   ;;  %s2312_s8 = smov 116  }
  0xa4   : > { %1904 = vmatprep.subr.mxu1 %v2311_v1  ;;  %1906 = vmatprep.mubr.msk.f32.mxu1 %vm2310_vm0, %v2311_v1  ;;  %v1985_v5 = vpack.c.bf16 %v338_v3, %v337_v2  ;;  %v1988_v7 = vpack.c.bf16 %v340_v6, %v339_v4  ;;  %v336_v8 = vld [vmem:[#allocation2] sm:$0xff]  ;;  %v426_v13 = vld [vmem:[%s2589_s17] sm:$0xff]  ;;  %s2313_s19 = smov 124   ;;  %s2314_s27 = smov 112   ;;  %vm586_vm3 = vcmask 1043456   ;;  %v1820_v15 = vld [vmem:[%s2589_s17 + $0x8] sm:$0xff] }
  0xa5   : > { %v1817_v9 = vld [vmem:[%s2751_s3] ss:$0 sm:$0xff]  ;;  %s2315_s18 = smov 120   ;;  %s2316_s10 = smov 104   ;;  %v422_v14 = vld [vmem:[#allocation8] sm:$0xff]  ;;  %vm582_vm4 = vcmask 31744  }
  0xa6   : > { %1986 = vmatpush3.bf16.msra.mxu0 %v1985_v5  ;;  %s2317_s12 = smov 108   ;;  %s2318_s20 = smov 100   ;;  %v581_v16 = vrot.slane %v422_v14, 4  ;;  %v1826_v23 = vld [vmem:[%s2589_s17 + $0x10] sm:$0xff]  ;;  %v1830_v25 = vld [vmem:[%s2589_s17 + $0x18] sm:$0xff]  ;;  %v1834_v27 = vld [vmem:[%s2589_s17 + $0x20] sm:$0xff] }
  0xa7   : > { %1987 = vmatprep.subr.bf16.mxu0 %v2309_v0  ;;  %v1838_v29 = vld [vmem:[%s2589_s17 + $0x28] sm:$0xff]  ;;  %v1842_v31 = vld [vmem:[%s2589_s17 + $0x30] sm:$0xff]  ;;  %v1846_v33 = vld [vmem:[%s2589_s17 + $0x38] sm:$0xff]  ;;  %s1816_s7 = sshll.u32 %s2586_s15, 3  ;;  %s2804_s2 = sshll.u32 %s2293_s24, 7 }
  0xa8   : > { %v423_v34 = vld [vmem:[#allocation8 + $0x8] sm:$0xff]  ;;  %v424_v43 = vld [vmem:[#allocation8 + $0x10] sm:$0xff]  ;;  %v425_v49 = vld [vmem:[#allocation8 + $0x18] sm:$0xff]  ;;  %s335_s16 = scalar_lea.vmem [#allocation10], %s1816_s7  ;;  %s2698_s30 = scalar_lea.hbm %s2754_s6, %s2804_s2 }
  0xa9   : > { %v967_v40 = vrot.slane %v423_v34, 4  ;;  %v1277_v46 = vrot.slane %v424_v43, 4  ;;  %v1587_v52 = vrot.slane %v425_v49, 4  ;;  %s1688_s0 = sshll.u32 %s335_s16, 4  ;;  %p2805_p0 = scmp.ne.s32.totalorder %s2780_s28, 0  ;;  %s2700_s0 = int_to_ptr.vmem [resolvable:$true] %s1688_s0 }
  0xaa   : > { %1989 = vmatpush3.bf16.msra.mxu0 %v1988_v7 }
  0xab   : > { %1919 = vmatprep.subr.mxu0 %v2311_v1 }
  0xad   : > { %1902 = vmatmul.mubr.msk.f32.vlgmr.msra.gmra.mrb[0].mxu0 %vm348_vm1, %v336_v8 }
  0xae   : > { %1921 = vmatprep.mubr.msk.f32.mxu0 %vm2310_vm0, %v2311_v1  ;;  %1920 = vmatpush3.msk.msra.mxu0 %vm586_vm3, %v422_v14 }
  0xaf   : > { %1929 = vmatprep.subr.mxu0 %v2311_v1 }
 0x180   : > { %v418_v10 = vpop.f32.mrb[0].mxu0 }
 0x181   : > { %v419_v11 = vadd.f32 %v1817_v9, %v418_v10  ;;  %v1903_v12 = vpop.f32.mrb[1].mxu0  ;;  %v1850_v9 = vld [vmem:[%s2753_s5] ss:$0 sm:$0xff] }
 0x183   : > { %891 = vrot.lane.b32.xlu1 %v419_v11, %s2312_s8  ;;  %504 = vrot.lane.b32.xlu0 %v419_v11, %s2313_s19  ;;  %s1674_s8 = scalar_lea.sflag [#allocation4], %s2586_s15  ;;  %s2207_s19 = scalar_lea.vmem %s2700_s0, 128 }
 0x184   : > { %1905 = vmatpush3.msra.mxu1 %v419_v11  ;;  %p2208_p7 = scmp.ne.s32.totalorder %s2700_s0, %s2207_s19 }
 0x185   : > { %1907 = vmatmul.mubr.msk.f32.vlgmr.msra.gmra.mrb[0].mxu1 %vm427_vm2, %v426_v13  ;;  %1909 = vmatprep.subr.mxu1 %v2311_v1 }
 0x186   : > { %1911 = vmatprep.mubr.msk.f32.mxu1 %vm2310_vm0, %v2311_v1  ;;  %p2209_p13 = pnand %p2208_p7, %p2805_p0 }
 0x187   : > { %1046 = vrot.lane.b32.xlu1 %v419_v11, %s2314_s27  ;;  %736 = vrot.lane.b32.xlu0 %v419_v11, %s2315_s18  ;;  %s2319_s27 = smov [#allocation10]  }
 0x188   : > { %p2210_p10 = pneg %p2209_p13  ;;  %s2211_s24 = sshll.u32 %s2319_s27, 4  ;;  %s2212_s24 = int_to_ptr.vmem [resolvable:$false] %s2211_s24 }
 0x189   : > { %s2213_s18 = scalar_lea.vmem %s2212_s24, 256  ;;  %p2214_p5 = scmp.lt.s32.totalorder %s2700_s0, %s2212_s24 }
 0x18a   : > { %p2215_p3 = scmp.lt.s32.totalorder %s2213_s18, %s2207_s19 }
 0x18b   : > { %1356 = vrot.lane.b32.xlu1 %v419_v11, %s2316_s10  ;;  %1201 = vrot.lane.b32.xlu0 %v419_v11, %s2317_s12 }
 0x18c   : > { %p2216_p9 = por %p2215_p3, %p2214_p5 }
 0x18e   : > { %p2217_p2 = pnand %p2216_p9, %p2210_p10 }
 0x18f   : > { %1511 = vrot.lane.b32.xlu0 %v419_v11, %s2318_s20 }
 0x1f5   : > { %v505_v17 = vpop.permute.xlu0 %504  ;;  %v892_v24 = vpop.permute.xlu1 %891 }
 0x1f6   : > { %1910 = vmatpush3.msra.mxu1 %v505_v17 }
 0x1f7   : > { %1912 = vmatmul.mubr.msk.f32.vlgmr.msra.gmra.mrb[2].mxu1 %vm427_vm2, %v1820_v15  ;;  %1914 = vmatprep.subr.mxu1 %v2311_v1 }
 0x1f8   : > { %1915 = vmatpush3.msk.msra.mxu1 %vm586_vm3, %v581_v16  ;;  %1916 = vmatprep.mubr.msk.f32.mxu1 %vm2310_vm0, %v2311_v1 }
 0x1f9   : > { %1924 = vmatprep.subr.mxu1 %v2311_v1  ;;  %v737_v21 = vpop.permute.xlu0 %736  ;;  %v1047_v26 = vpop.permute.xlu1 %1046 }
 0x1fd   : > { %v1202_v28 = vpop.permute.xlu0 %1201  ;;  %v1357_v30 = vpop.permute.xlu1 %1356 }
 0x201   : > { %v1512_v32 = vpop.permute.xlu0 %1511 }
 0x258   : > { %v497_v18 = vpop.f32.mrb[0].mxu1 }
 0x259   : > { %v1908_v19 = vpop.f32.mrb[1].mxu1  ;;  %1922 = vmatmul.mubr.msk.f32.vlgmr.msra.gmra.mrb[2].mxu0 %vm582_vm4, %v497_v18 }
 0x25a   : > { %1931 = vmatprep.mubr.msk.f32.mxu0 %vm2310_vm0, %v2311_v1  ;;  %1930 = vmatpush3.msk.msra.mxu0 %vm586_vm3, %v423_v34 }
 0x25b   : > { %1939 = vmatprep.subr.mxu0 %v2311_v1 }
 0x2ca   : > { %v576_v20 = vpop.f32.mrb[2].mxu1 }
 0x2cb   : > { %1917 = vmatmul.mubr.msk.f32.vlgmr.msra.gmra.mrb[4].mxu1 %vm582_vm4, %v576_v20  ;;  %v1913_v22 = vpop.f32.mrb[3].mxu1 }
 0x2cc   : > { %1925 = vmatpush3.msra.mxu1 %v737_v21  ;;  %1926 = vmatprep.mubr.msk.f32.mxu1 %vm2310_vm0, %v2311_v1 }
 0x2cd   : > { %1934 = vmatprep.subr.mxu1 %v2311_v1 }
 0x2cf   : > { %1927 = vmatmul.mubr.msk.f32.vlgmr.msra.gmra.mrb[6].mxu1 %vm427_vm2, %v1826_v23 }
 0x2d0   : > { %1935 = vmatpush3.msra.mxu1 %v892_v24  ;;  %1936 = vmatprep.mubr.msk.f32.mxu1 %vm2310_vm0, %v2311_v1 }
 0x2d1   : > { %1944 = vmatprep.subr.mxu1 %v2311_v1 }
 0x2d3   : > { %1937 = vmatmul.mubr.msk.f32.vlgmr.msra.gmra.mrb[8].mxu1 %vm427_vm2, %v1830_v25 }
 0x2d4   : > { %1945 = vmatpush3.msra.mxu1 %v1047_v26  ;;  %1946 = vmatprep.mubr.msk.f32.mxu1 %vm2310_vm0, %v2311_v1 }
 0x2d5   : > { %1954 = vmatprep.subr.mxu1 %v2311_v1 }
 0x2d7   : > { %1947 = vmatmul.mubr.msk.f32.vlgmr.msra.gmra.mrb[10].mxu1 %vm427_vm2, %v1834_v27 }
 0x2d8   : > { %1955 = vmatpush3.msra.mxu1 %v1202_v28  ;;  %1956 = vmatprep.mubr.msk.f32.mxu1 %vm2310_vm0, %v2311_v1 }
 0x2d9   : > { %1964 = vmatprep.subr.mxu1 %v2311_v1 }
 0x2db   : > { %1957 = vmatmul.mubr.msk.f32.vlgmr.msra.gmra.mrb[12].mxu1 %vm427_vm2, %v1838_v29 }
 0x2dc   : > { %1965 = vmatpush3.msra.mxu1 %v1357_v30  ;;  %1966 = vmatprep.mubr.msk.f32.mxu1 %vm2310_vm0, %v2311_v1 }
 0x2dd   : > { %1974 = vmatprep.subr.mxu1 %v2311_v1 }
 0x2df   : > { %1967 = vmatmul.mubr.msk.f32.vlgmr.msra.gmra.mrb[14].mxu1 %vm427_vm2, %v1842_v31 }
 0x2e0   : > { %1975 = vmatpush3.msra.mxu1 %v1512_v32  ;;  %1976 = vmatprep.mubr.msk.f32.mxu1 %vm2310_vm0, %v2311_v1 }
 0x2e3   : > { %1977 = vmatmul.mubr.msk.f32.vlgmr.msra.gmra.mrb[16].mxu1 %vm427_vm2, %v1846_v33 }
 0x32c   : > { %v730_v35 = vpop.f32.mrb[2].mxu0 }
 0x32d   : > { %v1923_v36 = vpop.f32.mrb[3].mxu0 }
 0x39e   : > { %v655_v37 = vpop.f32.mrb[4].mxu1 }
 0x39f   : > { %v731_v38 = vadd.f32 %v730_v35, %v655_v37  ;;  %v1918_v39 = vpop.f32.mrb[5].mxu1 }
 0x3a2   : > { %v808_v41 = vpop.f32.mrb[6].mxu1 }
 0x3a3   : > { %1932 = vmatmul.mubr.msk.f32.vlgmr.msra.gmra.mrb[4].mxu0 %vm582_vm4, %v808_v41  ;;  %v1928_v42 = vpop.f32.mrb[7].mxu1 }
 0x3a4   : > { %1940 = vmatpush3.msk.msra.mxu0 %vm586_vm3, %v967_v40  ;;  %1941 = vmatprep.mubr.msk.f32.mxu0 %vm2310_vm0, %v2311_v1 }
 0x3a5   : > { %1949 = vmatprep.subr.mxu0 %v2311_v1 }
 0x3a6   : > { %v963_v44 = vpop.f32.mrb[8].mxu1 }
 0x3a7   : > { %1942 = vmatmul.mubr.msk.f32.vlgmr.msra.gmra.mrb[6].mxu0 %vm582_vm4, %v963_v44  ;;  %v1938_v45 = vpop.f32.mrb[9].mxu1 }
 0x3a8   : > { %1950 = vmatpush3.msk.msra.mxu0 %vm586_vm3, %v424_v43  ;;  %1951 = vmatprep.mubr.msk.f32.mxu0 %vm2310_vm0, %v2311_v1 }
 0x3a9   : > { %1959 = vmatprep.subr.mxu0 %v2311_v1 }
 0x3aa   : > { %v1118_v47 = vpop.f32.mrb[10].mxu1 }
 0x3ab   : > { %1952 = vmatmul.mubr.msk.f32.vlgmr.msra.gmra.mrb[8].mxu0 %vm582_vm4, %v1118_v47  ;;  %v1948_v48 = vpop.f32.mrb[11].mxu1 }
 0x3ac   : > { %1960 = vmatpush3.msk.msra.mxu0 %vm586_vm3, %v1277_v46  ;;  %1961 = vmatprep.mubr.msk.f32.mxu0 %vm2310_vm0, %v2311_v1 }
 0x3ad   : > { %1969 = vmatprep.subr.mxu0 %v2311_v1 }
 0x3ae   : > { %v1273_v50 = vpop.f32.mrb[12].mxu1 }
 0x3af   : > { %1962 = vmatmul.mubr.msk.f32.vlgmr.msra.gmra.mrb[10].mxu0 %vm582_vm4, %v1273_v50  ;;  %v1958_v51 = vpop.f32.mrb[13].mxu1 }
 0x3b0   : > { %1970 = vmatpush3.msk.msra.mxu0 %vm586_vm3, %v425_v49  ;;  %1971 = vmatprep.mubr.msk.f32.mxu0 %vm2310_vm0, %v2311_v1 }
 0x3b1   : > { %1979 = vmatprep.subr.mxu0 %v2311_v1 }
 0x3b2   : > { %v1428_v53 = vpop.f32.mrb[14].mxu1 }
 0x3b3   : > { %1972 = vmatmul.mubr.msk.f32.vlgmr.msra.gmra.mrb[12].mxu0 %vm582_vm4, %v1428_v53  ;;  %v1968_v54 = vpop.f32.mrb[15].mxu1 }
 0x3b4   : > { %1980 = vmatpush3.msk.msra.mxu0 %vm586_vm3, %v1587_v52  ;;  %1981 = vmatprep.mubr.msk.f32.mxu0 %vm2310_vm0, %v2311_v1 }
 0x3b6   : > { %v1583_v55 = vpop.f32.mrb[16].mxu1 }
 0x3b7   : > { %1982 = vmatmul.mubr.msk.f32.vlgmr.msra.gmra.mrb[14].mxu0 %vm582_vm4, %v1583_v55  ;;  %v1978_v56 = vpop.f32.mrb[17].mxu1 }
 0x476   : > { %v884_v57 = vpop.f32.mrb[4].mxu0 }
 0x477   : > { %v888_v58 = vadd.f32 %v884_v57, %v731_v38  ;;  %v1933_v59 = vpop.f32.mrb[5].mxu0 }
 0x47a   : > { %v1039_v60 = vpop.f32.mrb[6].mxu0 }
 0x47b   : > { %v1043_v61 = vadd.f32 %v1039_v60, %v888_v58  ;;  %v1943_v62 = vpop.f32.mrb[7].mxu0 }
 0x47e   : > { %v1194_v63 = vpop.f32.mrb[8].mxu0 }
 0x47f   : > { %v1198_v0 = vadd.f32 %v1194_v63, %v1043_v61  ;;  %v1953_v2 = vpop.f32.mrb[9].mxu0 }
 0x482   : > { %v1349_v3 = vpop.f32.mrb[10].mxu0 }
 0x483   : > { %v1353_v4 = vadd.f32 %v1349_v3, %v1198_v0  ;;  %v1963_v5 = vpop.f32.mrb[11].mxu0 }
 0x486   : > { %v1504_v1 = vpop.f32.mrb[12].mxu0 }
 0x487   : > { %v1508_v6 = vadd.f32 %v1504_v1, %v1353_v4  ;;  %v1973_v7 = vpop.f32.mrb[13].mxu0 }
 0x48a   : > { %v1659_v8 = vpop.f32.mrb[14].mxu0 }
 0x48b   : > { %v1663_v10 = vadd.f32 %v1659_v8, %v1508_v6  ;;  %v1983_v11 = vpop.f32.mrb[15].mxu0 }
 0x48d   : > { %v1671_v12 = vadd.f32 %v1850_v9, %v1663_v10 }
 0x48f   : > { %1672 = vst.msk [vmem:[%s335_s16] sm:$0xff] %vm348_vm1, %v1671_v12 }
 0x490   : > { %2220 = shalt.err (!%p2217_p2)
}
 0x491   : > { %s2221_s15 = scalar_lea.hbm %s2698_s30, 128  ;;  %s2225_s20 = scalar_lea.hbm %s2754_s6, 256 }
 0x492   : > { %p2222_p1 = scmp.ne.s32.totalorder %s2698_s30, %s2221_s15  ;;  %p2226_p4 = scmp.lt.u32.totalorder %s2698_s30, %s2754_s6 }
 0x493   : > { %p2227_p8 = scmp.lt.u32.totalorder %s2225_s20, %s2221_s15  ;;  %p2229_p7 = scmp.lt.u32.totalorder %s2221_s15, %s2698_s30 }
 0x494   : > { %p2223_p11 = pnand %p2222_p1, %p2805_p0 }
 0x495   : > { %p2228_p12 = por %p2227_p8, %p2226_p4 }
 0x496   : > { %p2224_p6 = pneg %p2223_p11 }
 0x497   : > { %p2230_p13 = por %p2229_p7, %p2228_p12 }
 0x499   : > { %p2231_p10 = pnand %p2230_p13, %p2224_p6 }
 0x49b   : > { %2234 = shalt.err (!%p2231_p10)
}
 0x49c   : > { %2002 = dma.vmem_to_hbm [thread:$0]  (%p2805_p0), %s2700_s0, 128, %s2698_s30, %s1674_s8  }
 0x49d PF: > { %s1700_s4 = sand.u32 1, %s2281_s21   ;;  %p2806_p5 = scmp.ne.s32.totalorder %s2781_s11, 0 }
 0x49e   : > { %p2807_p3 = scmp.ge.s32.totalorder %s2301_s26, 2  ;;  %s1701_s16 = scalar_lea.sflag [#allocation4], %s1700_s4 }
 0x4a0   : > { %p2019_p9 = pnand %p2807_p3, %p2806_p5 }
 0x4a2   : > { %2276 = dma.done.wait (!%p2019_p9), %s1701_s16, 128  }
 0x4a3   : > { %2278 = vsyncadd (!%p2019_p9), %s1701_s16, 4294967168  ;;  %s24_s26 = sadd.s32 1, %s2301_s26   ;;  %s2808_s21 = smov %s2285_s22 }
 0x4a4   : > { %p21_p2 = scmp.ge.s32.totalorder %s24_s26, 4   ;;  %s2809_s22 = smov %s2289_s23 }
 0x4a5   : > { %s2810_s23 = smov %s2576_s9  ;;  %s2811_s24 = smov %s2297_s25 }
 0x4a6   : > { %s2812_s25 = smov %s2814_s13  ;;  %23 = sbr.rel (!%p21_p2) target bundleno = 12 (0xc), region = 110 }
 0x4ad   :  { %1706 = vsyncpa [#allocation3], 1 }
 0x4ae   :  { %1708 = vsyncpa [#allocation3 + $0x1], 1 }
 0x4af   :  { %1709 = vsyncpa [#allocation6], 1 }
 0x4b0   :  { %1711 = vsyncpa [#allocation6 + $0x1], 1 }
 0x4b1   :  { %1712 = vsyncpa [#allocation9], 1 }
 0x4b2   :  { %1713 = vsyncpa [#allocation4], 1 }
 0x4b3   :  { %1715 = vsyncpa [#allocation4 + $0x1], 1 }

</bundles_post_ra>
